<compile_context>
chip_gen: v5e
topology: v5e:2x2
jax: 0.10.0
libtpu: 0.0.40
codegen_flags: <defaults>
</compile_context>

<pallas_src>
import math

import jax
import jax.numpy as jnp
from jax.experimental import pallas as pl
from jax.experimental.pallas import tpu as pltpu


D_MODEL = 32
MAX_LEN = 64
SEQ_LEN = 16
BATCH = 2

_VMEM_BUDGET = 24 * 1024 * 1024   # per-step tile budget: 3 arrays x 2 pipeline buffers
_VMEM_LIMIT = 32 * 1024 * 1024    # scoped-VMEM limit, within v7x's 64 MiB physical


def _make_pe_table(max_len, d_model):
    """Sinusoidal table, shape (max_len, d_model). Built once at init time."""
    position = jnp.arange(max_len, dtype=jnp.float32)[:, None]                 # (L, 1)
    div_term = jnp.exp(jnp.arange(0, d_model, 2, dtype=jnp.float32)
                       * (-math.log(10000.0) / d_model))                       # (D/2,)
    ang = position * div_term                                                  # (L, D/2)
    # Interleave sin/cos (cols 0::2 = sin, 1::2 = cos) without scatter writes.
    return jnp.stack([jnp.sin(ang), jnp.cos(ang)], axis=-1).reshape(max_len, d_model)


# ------------------------------- Pallas kernel ----------------------------------------
def _add_kernel(x_ref, pe_ref, o_ref):
    # Flat path:      x (TR, 128) + pe (TR, 128)           -> plain vector add.
    # Fallback path:  x (TL, B, D) + pe (TL, 1, D)          -> broadcast over batch.
    o_ref[...] = x_ref[...] + pe_ref[...]


def _largest_tile(n, bytes_per_unit):
    """Largest leading-axis tile whose double-buffered 3-array footprint fits the
    VMEM budget; the whole problem (single block, no per-step overhead) if it fits."""
    t_max = max(1, _VMEM_BUDGET // (6 * bytes_per_unit))
    if n <= t_max:
        return n
    t = max(8, (t_max // 8) * 8)
    while t > 8 and n % t != 0:
        t -= 8
    return t if n % t == 0 else n   # no divisor fits the budget: fall back to one block


def positional_encoding_fwd(x, pe):
    """x: (L, B, D);  pe: (max_len, D) with max_len >= L.  Returns x + pe[:L, None, :]."""
    L, B, D = x.shape
    itemsize = jnp.dtype(x.dtype).itemsize
    pe_l = pe[:L].astype(x.dtype)

    total = L * B * D
    if total % 128 == 0:
        # ---- lane-dense fast path: both operands presented as (rows, 128) slabs ----
        rows = total // 128
        x2 = x.reshape(rows, 128)
        pe2 = jnp.broadcast_to(pe_l[:, None, :], (L, B, D)).reshape(rows, 128)
        tr = _largest_tile(rows, 128 * itemsize)
        n_tiles = rows // tr
        out2 = pl.pallas_call(
            _add_kernel,
            grid=(n_tiles,),
            in_specs=[pl.BlockSpec((tr, 128), lambda i: (i, 0)),
                      pl.BlockSpec((tr, 128), lambda i: (i, 0))],
            out_specs=pl.BlockSpec((tr, 128), lambda i: (i, 0)),
            out_shape=jax.ShapeDtypeStruct((rows, 128), x.dtype),
            input_output_aliases={0: 0},             # x is dead after the add
            compiler_params=pltpu.CompilerParams(
                dimension_semantics=("parallel",) if n_tiles > 1 else ("arbitrary",),
                vmem_limit_bytes=_VMEM_LIMIT),
        )(x2, pe2)
        return out2.reshape(L, B, D)

    # ---- fallback: total size not lane-aligned; 3-D blocks, broadcast over batch ----
    tl = _largest_tile(L, (B + 1) * D * itemsize)
    n_tiles = L // tl
    return pl.pallas_call(
        _add_kernel,
        grid=(n_tiles,),
        in_specs=[pl.BlockSpec((tl, B, D), lambda i: (i, 0, 0)),
                  pl.BlockSpec((tl, 1, D), lambda i: (i, 0, 0))],
        out_specs=pl.BlockSpec((tl, B, D), lambda i: (i, 0, 0)),
        out_shape=jax.ShapeDtypeStruct((L, B, D), x.dtype),
        input_output_aliases={0: 0},
        compiler_params=pltpu.CompilerParams(
            dimension_semantics=("parallel",) if n_tiles > 1 else ("arbitrary",),
            vmem_limit_bytes=_VMEM_LIMIT),
    )(x, pe_l[:, None, :])


class PositionalEncoding:
    """Eval-mode PositionalEncoding (dropout == identity)."""

    def __init__(self, d_model, dropout=0.1, max_len=5000):
        # The PyTorch reference defaults max_len=-1, which cannot build a table; use a
        # sane default (callers normally pass max_len explicitly, as the test does).
        if max_len is None or max_len <= 0:
            max_len = 5000
        self.dropout_p = dropout
        self.pe = _make_pe_table(max_len, d_model)       # (max_len, d_model) buffer
        self._fwd = jax.jit(positional_encoding_fwd)     # fuses layout plumbing w/ kernel

    def __call__(self, x):
        # TODO(synk): train-mode stochastic dropout not implemented (eval forward only).
        return self._fwd(x, self.pe)


# --------------------------------------- main -----------------------------------------
if __name__ == "__main__":
    key = jax.random.PRNGKey(0)
    x = jax.random.normal(key, (SEQ_LEN, BATCH, D_MODEL), jnp.float32)

    module = PositionalEncoding(D_MODEL, dropout=0.1, max_len=MAX_LEN)
    out = jax.block_until_ready(module(x))

    # pure-JAX reference check of the forward semantics
    ref = x + module.pe[:SEQ_LEN][:, None, :]
    assert out.shape == (SEQ_LEN, BATCH, D_MODEL)
    assert bool(jnp.all(jnp.isfinite(out)))
    assert bool(jnp.allclose(out, ref, atol=1e-6, rtol=1e-6))
    print("KERNEL_OK")
</pallas_src>

<mosaic_0001>
module attributes {stable_mosaic.version = 11 : i64} {
  func.func @_add_kernel(%arg0: i32, %arg1: memref<8x128xf32, #tpu.memory_space<vmem>>, %arg2: memref<8x128xf32, #tpu.memory_space<vmem>>, %arg3: memref<8x128xf32, #tpu.memory_space<vmem>>) attributes {dimension_semantics = [#tpu.dimension_semantics<arbitrary>], iteration_bounds = array<i64: 1>, scalar_prefetch = 0 : i64, scratch_operands = 0 : i64, tpu.core_type = #tpu.core_type<tc>, window_params = [{transform_indices = @transform_0, window_bounds = array<i64: 8, 128>}, {transform_indices = @transform_1, window_bounds = array<i64: 8, 128>}, {transform_indices = @transform_2, window_bounds = array<i64: 8, 128>}]} {
    %c0 = arith.constant 0 : index
    %c0_0 = arith.constant 0 : index
    %0 = vector.load %arg1[%c0, %c0_0] : memref<8x128xf32, #tpu.memory_space<vmem>>, vector<8x128xf32>
    %c0_1 = arith.constant 0 : index
    %c0_2 = arith.constant 0 : index
    %1 = vector.load %arg2[%c0_1, %c0_2] : memref<8x128xf32, #tpu.memory_space<vmem>>, vector<8x128xf32>
    %2 = arith.addf %0, %1 : vector<8x128xf32>
    %c0_3 = arith.constant 0 : index
    %c0_4 = arith.constant 0 : index
    %3 = vector.load %arg3[%c0_3, %c0_4] : memref<8x128xf32, #tpu.memory_space<vmem>>, vector<8x128xf32>
    tpu.vector_store %arg3[%c0_3, %c0_4], %2 {strides = array<i32>} : memref<8x128xf32, #tpu.memory_space<vmem>>, vector<8x128xf32>,
    return
  }
  func.func @transform_0(%arg0: i32) -> (i32, i32) {
    %c0_i32 = arith.constant 0 : i32
    %c0_i32_0 = arith.constant 0 : i32
    return %arg0, %c0_i32 : i32, i32
  }
  func.func @transform_1(%arg0: i32) -> (i32, i32) {
    %c0_i32 = arith.constant 0 : i32
    %c0_i32_0 = arith.constant 0 : i32
    return %arg0, %c0_i32 : i32, i32
  }
  func.func @transform_2(%arg0: i32) -> (i32, i32) {
    %c0_i32 = arith.constant 0 : i32
    %c0_i32_0 = arith.constant 0 : i32
    return %arg0, %c0_i32 : i32, i32
  }
}

</mosaic_0001>

<bundles_post_ra>
// kernel: positional_encoding_fwd.1
= control target key start
LH: loop header
LB: loop body
LE: loop exit
PB: predicated region body
PF: predicated region fallthrough
CT: control target
= control target key end

     0   :  { %s43_s0 = inlined_call_operand.vmem [shape: f32[8,128], index: 0, kind: input, shape index: {}, may-alias: {0,2}]   ;;  %s44_s1 = inlined_call_operand.vmem [shape: f32[8,128], index: 1, kind: input, shape index: {}]   ;;  %s45_s2 = inlined_call_operand.vmem [shape: f32[8,128], index: 2, kind: output, shape index: {}, may-alias: {0,2}]  }
   0x1   :  { %v11_v0 = vld [vmem:[%s43_s0] sm:$0xff] }
   0x2   :  { %v12_v1 = vld [vmem:[%s44_s1] sm:$0xff] }
   0x3   :  { %v13_v2 = vadd.f32 %v12_v1, %v11_v0 }
   0x5   :  { %14 = vst [vmem:[%s45_s2] sm:$0xff] %v13_v2 }

</bundles_post_ra>
